<compile_context>
chip_gen: v7x
topology: tpu7x:2x2x1
jax: 0.10.0
libtpu: 0.0.40
codegen_flags: <defaults>
</compile_context>

<pallas_src>
import functools

import jax
import jax.numpy as jnp
import numpy as np
from jax.experimental import pallas as pl
from jax.experimental.pallas import tpu as pltpu

KH = KW = 3


def _round_up(x, m):
    return (x + m - 1) // m * m


def _gdconv_matmul_kernel(x_ref, w_ref, b_ref, o_ref):
    """One lane tile of the im2col GEMM: out = relu(W @ X + b).

    x_ref: (K_pad, TILE_N)      im2col columns (taps*Cin on sublanes,
                                flattened B*D*H*W spatial on lanes)
    w_ref: (Cout_pad, K_pad)    BN-folded conv weight (VMEM-resident)
    b_ref: (Cout_pad, 1)        BN-folded bias, f32 (VMEM-resident)
    o_ref: (Cout_pad, TILE_N)   lane-dense output tile
    """
    acc = jnp.dot(w_ref[...], x_ref[...], preferred_element_type=jnp.float32)
    o_ref[...] = jnp.maximum(acc + b_ref[...], 0.0).astype(o_ref.dtype)


def gdconv3d_forward(x, d, w_hwio, bn_gamma, bn_beta, bn_mean, bn_var,
                     eps=1e-5, compute_dtype=jnp.bfloat16, tile_n_max=16384,
                     offset_conv_weight=None):
    """GDConv3D forward.  x: (B,Cin,D,H,W), d: (B,Coff,D,H,W) -> (B,Cout,D,H,W).

    `d` only feeds the zero-initialised offset conv, so offsets are
    identically zero and deform_conv2d reduces to a plain 3x3 conv.
    """
    if offset_conv_weight is not None:
        try:
            ow = np.asarray(offset_conv_weight)
        except Exception:   # traced value; cannot check at trace time
            ow = None
        if ow is not None and np.any(ow != 0.0):
            # TODO(synk): nonzero (trained) deformable offsets (bilinear
            # sampling) are not implemented.
            raise NotImplementedError(
                "gdconv3d_forward only supports the zero-initialised "
                "offset_conv (offsets == 0 -> plain 3x3 conv).")
    del d  # offsets are identically zero -> d never influences the output

    B, cin, D, H, W = x.shape
    cout = w_hwio.shape[-1]
    K = KH * KW * cin
    BD = B * D

    # Sublane packing: f32 packs 8 rows / vreg, bf16 packs 16.
    sub = 8 * (4 // jnp.dtype(compute_dtype).itemsize)
    k_pad = _round_up(K, sub)
    cout_pad = _round_up(cout, 8)

    # ---- Fold eval-mode BatchNorm into the conv weight / bias (glue). ----
    scale = (bn_gamma / jnp.sqrt(bn_var + eps)).astype(jnp.float32)
    w_fold = w_hwio.astype(jnp.float32) * scale[None, None, None, :]
    # (KH, KW, Cin, Cout) -> (Cout, K) with K ordered (kh, kw, cin).
    w2 = jnp.transpose(w_fold, (3, 0, 1, 2)).reshape(cout, K)
    w2 = jnp.pad(w2, ((0, cout_pad - cout), (0, k_pad - K)))
    w2 = w2.astype(compute_dtype)
    b2 = jnp.pad(bn_beta - bn_mean * scale, (0, cout_pad - cout))
    b2 = b2.reshape(cout_pad, 1).astype(jnp.float32)

    # ---- im2col: build the lane-dense (K, B*D*H*W) slab (glue, done by XLA).
    # Channel-major layout first (channels never touch the lane axis), then
    # pad once and stack the 9 shifted taps along the K axis.
    x_cm = jnp.transpose(x, (1, 0, 2, 3, 4)).reshape(cin, BD, H, W)
    x_cm = x_cm.astype(compute_dtype)
    x_halo = jnp.pad(x_cm, ((0, 0), (0, 0), (1, 1), (1, 1)))
    taps = [x_halo[:, :, kh:kh + H, kw:kw + W]
            for kh in range(KH) for kw in range(KW)]
    # (KH*KW, Cin, BD, H, W) -> (K, BD*H*W); k = (kh*KW + kw)*Cin + c.
    x_col = jnp.stack(taps, axis=0).reshape(K, BD * H * W)

    n_total = BD * H * W
    tile_n = min(tile_n_max, _round_up(n_total, 128))
    n_pad = _round_up(n_total, tile_n)
    if (k_pad != K) or (n_pad != n_total):
        x_col = jnp.pad(x_col, ((0, k_pad - K), (0, n_pad - n_total)))

    out_col = pl.pallas_call(
        _gdconv_matmul_kernel,
        out_shape=jax.ShapeDtypeStruct((cout_pad, n_pad), jnp.float32),
        grid_spec=pltpu.PrefetchScalarGridSpec(
            num_scalar_prefetch=0,
            grid=(n_pad // tile_n,),
            in_specs=[
                pl.BlockSpec((k_pad, tile_n), lambda n: (0, n)),
                pl.BlockSpec((cout_pad, k_pad), lambda n: (0, 0)),  # resident
                pl.BlockSpec((cout_pad, 1), lambda n: (0, 0)),      # resident
            ],
            out_specs=pl.BlockSpec((cout_pad, tile_n), lambda n: (0, n)),
        ),
        compiler_params=pltpu.CompilerParams(
            dimension_semantics=("parallel",)),
    )(x_col, w2, b2)

    # Back to PyTorch NCDHW: (B, Cout, D, H, W).
    out = out_col[:cout, :n_total].reshape(cout, B, D, H, W)
    return jnp.transpose(out, (1, 0, 2, 3, 4))


def _reference(x, w_hwio, bn_gamma, bn_beta, bn_mean, bn_var, eps=1e-5):
    B, cin, D, H, W = x.shape
    cout = w_hwio.shape[-1]
    xs = jnp.transpose(x, (0, 2, 3, 4, 1)).reshape(B * D, H, W, cin)
    y = jax.lax.conv_general_dilated(
        xs, w_hwio, window_strides=(1, 1), padding="SAME",
        dimension_numbers=("NHWC", "HWIO", "NHWC"))
    y = (y - bn_mean) / jnp.sqrt(bn_var + eps) * bn_gamma + bn_beta
    y = jnp.maximum(y, 0.0)
    y = y.reshape(B, D, H, W, cout)
    return jnp.transpose(y, (0, 4, 1, 2, 3))


if __name__ == "__main__":
    B, Cin, Coff, Cout, D, H, W = 2, 4, 4, 8, 3, 16, 16

    key = jax.random.PRNGKey(0)
    kx, kd, kw = jax.random.split(key, 3)
    x = jax.random.normal(kx, (B, Cin, D, H, W), jnp.float32)
    d = jax.random.normal(kd, (B, Coff, D, H, W), jnp.float32)

    # regular_conv weight (HWIO), deterministic uniform init (fan-in bound).
    fan_in = Cin * KH * KW
    bound = 1.0 / np.sqrt(fan_in)
    w_hwio = jax.random.uniform(kw, (KH, KW, Cin, Cout), jnp.float32,
                                minval=-bound, maxval=bound)
    # offset_conv.weight is zero-initialised in __init__ -> offsets are 0.
    offset_w = jnp.zeros((2 * KH * KW, Coff, 3, 3), jnp.float32)

    # BatchNorm2d default parameters / running stats (eval mode).
    bn_gamma = jnp.ones((Cout,), jnp.float32)
    bn_beta = jnp.zeros((Cout,), jnp.float32)
    bn_mean = jnp.zeros((Cout,), jnp.float32)
    bn_var = jnp.ones((Cout,), jnp.float32)

    ref = jax.block_until_ready(
        _reference(x, w_hwio, bn_gamma, bn_beta, bn_mean, bn_var))

    # f32 compute path: tight check of im2col indexing / BN folding / padding.
    fwd_f32 = jax.jit(functools.partial(
        gdconv3d_forward, compute_dtype=jnp.float32,
        offset_conv_weight=offset_w))
    out_f32 = jax.block_until_ready(
        fwd_f32(x, d, w_hwio, bn_gamma, bn_beta, bn_mean, bn_var))
    np.testing.assert_allclose(np.asarray(out_f32), np.asarray(ref),
                               rtol=1e-4, atol=1e-4)

    # bf16 compute path (perf default on v6e/v7x), f32 MXU accumulation.
    fwd_bf16 = jax.jit(functools.partial(
        gdconv3d_forward, compute_dtype=jnp.bfloat16,
        offset_conv_weight=offset_w))
    out_bf16 = jax.block_until_ready(
        fwd_bf16(x, d, w_hwio, bn_gamma, bn_beta, bn_mean, bn_var))
    np.testing.assert_allclose(np.asarray(out_bf16), np.asarray(ref),
                               rtol=5e-2, atol=5e-2)

    assert out_f32.shape == (B, Cout, D, H, W)
    print("KERNEL_OK")
</pallas_src>

<mosaic_0001>
module attributes {stable_mosaic.version = 11 : i64} {
  func.func @_gdconv_matmul_kernel(%arg0: i32, %arg1: memref<40x1536xf32, #tpu.memory_space<vmem>>, %arg2: memref<8x40xf32, #tpu.memory_space<vmem>>, %arg3: memref<8x1xf32, #tpu.memory_space<vmem>>, %arg4: memref<8x1536xf32, #tpu.memory_space<vmem>>) attributes {dimension_semantics = [#tpu.dimension_semantics<parallel>], iteration_bounds = array<i64: 1>, scalar_prefetch = 0 : i64, scratch_operands = 0 : i64, tpu.core_type = #tpu.core_type<tc>, window_params = [{transform_indices = @transform_0, window_bounds = array<i64: 40, 1536>}, {pipeline_mode = #tpu.pipeline_mode<synchronous>, transform_indices = @transform_1, window_bounds = array<i64: 8, 40>}, {pipeline_mode = #tpu.pipeline_mode<synchronous>, transform_indices = @transform_2, window_bounds = array<i64: 8, 1>}, {transform_indices = @transform_3, window_bounds = array<i64: 8, 1536>}]} {
    %c0 = arith.constant 0 : index
    %c0_0 = arith.constant 0 : index
    %0 = vector.load %arg2[%c0, %c0_0] : memref<8x40xf32, #tpu.memory_space<vmem>>, vector<8x40xf32>
    %c0_1 = arith.constant 0 : index
    %c0_2 = arith.constant 0 : index
    %1 = vector.load %arg1[%c0_1, %c0_2] : memref<40x1536xf32, #tpu.memory_space<vmem>>, vector<40x1536xf32>
    %cst = arith.constant dense<0.000000e+00> : vector<8x1536xf32>
    %2 = tpu.matmul %0, %1, %cst {dimension_numbers = #tpu.dot_dimension_numbers<[1], [0], [0], [1], [0, 0, 1, 1], [], []>} : vector<8x40xf32>, vector<40x1536xf32>, vector<8x1536xf32> -> vector<8x1536xf32>
    %c0_3 = arith.constant 0 : index
    %c0_4 = arith.constant 0 : index
    %3 = vector.load %arg3[%c0_3, %c0_4] : memref<8x1xf32, #tpu.memory_space<vmem>>, vector<8x1xf32>
    %4 = vector.broadcast %3 : vector<8x1xf32> to vector<8x1536xf32>
    %5 = arith.addf %2, %4 : vector<8x1536xf32>
    %cst_5 = arith.constant 0.000000e+00 : f32
    %6 = vector.broadcast %cst_5 : f32 to vector<8x1536xf32>
    %7 = arith.maximumf %5, %6 : vector<8x1536xf32>
    %c0_6 = arith.constant 0 : index
    %c0_7 = arith.constant 0 : index
    %8 = vector.load %arg4[%c0_6, %c0_7] : memref<8x1536xf32, #tpu.memory_space<vmem>>, vector<8x1536xf32>
    tpu.vector_store %arg4[%c0_6, %c0_7], %7 {strides = array<i32>} : memref<8x1536xf32, #tpu.memory_space<vmem>>, vector<8x1536xf32>,
    return
  }
  func.func @transform_0(%arg0: i32) -> (i32, i32) {
    %c0_i32 = arith.constant 0 : i32
    %c0_i32_0 = arith.constant 0 : i32
    return %c0_i32, %arg0 : i32, i32
  }
  func.func @transform_1(%arg0: i32) -> (i32, i32) {
    %c0_i32 = arith.constant 0 : i32
    %c0_i32_0 = arith.constant 0 : i32
    %c0_i32_1 = arith.constant 0 : i32
    return %c0_i32, %c0_i32_0 : i32, i32
  }
  func.func @transform_2(%arg0: i32) -> (i32, i32) {
    %c0_i32 = arith.constant 0 : i32
    %c0_i32_0 = arith.constant 0 : i32
    %c0_i32_1 = arith.constant 0 : i32
    return %c0_i32, %c0_i32_0 : i32, i32
  }
  func.func @transform_3(%arg0: i32) -> (i32, i32) {
    %c0_i32 = arith.constant 0 : i32
    %c0_i32_0 = arith.constant 0 : i32
    return %c0_i32, %arg0 : i32, i32
  }
}

</mosaic_0001>

<bundles_post_ra>
// kernel: gdconv3d_forward.1
= control target key start
LH: loop header
LB: loop body
LE: loop exit
PB: predicated region body
PF: predicated region fallthrough
CT: control target
= control target key end

     0   :  { %v596_v3 = vmov 0.0   ;;  %v597_v8 = vmov 0   ;;  %vm81_vm0 = vcmask 326656   ;;  %s860_s0 = inlined_call_operand.vmem [shape: f32[40,1536], index: 0, kind: input, shape index: {}]   ;;  %s861_s1 = inlined_call_operand.vmem [shape: f32[8,40], index: 1, kind: input, shape index: {}]   ;;  %s862_s2 = inlined_call_operand.vmem [shape: f32[8,1], index: 2, kind: input, shape index: {}]   ;;  %s863_s3 = inlined_call_operand.vmem [shape: f32[8,1536], index: 3, kind: output, shape index: {}]  }
   0x1   :  { %v16_v0 = vld [vmem:[%s860_s0 + $0x8] sm:$0xff]  ;;  %v18_v2 = vld [vmem:[%s860_s0 + $0x18] sm:$0xff]  ;;  %149 = vmatprep.mubr.f32.mxu0 %v596_v3  ;;  %220 = vmatprep.mubr.f32.mxu1 %v596_v3  ;;  %v15_v6 = vld [vmem:[%s860_s0] sm:$0xff] }
   0x2   :  { %v28_v1 = vld [vmem:[%s860_s0 + $0x68] sm:$0xff]  ;;  %v30_v5 = vld [vmem:[%s860_s0 + $0x78] sm:$0xff]  ;;  %v27_v7 = vld [vmem:[%s860_s0 + $0x60] sm:$0xff]  ;;  %595 = vset.pattern.permute.xlu0 %v597_v8 }
   0x3   :  { %v545_v4 = vpack.c.bf16 %v28_v1, %v16_v0  ;;  %v553_v9 = vpack.c.bf16 %v30_v5, %v18_v2  ;;  %v547_v10 = vpack.c.bf16 %v27_v7, %v15_v6  ;;  %v17_v11 = vld [vmem:[%s860_s0 + $0x10] sm:$0xff]  ;;  %v40_v13 = vld [vmem:[%s860_s0 + $0xc8] sm:$0xff]  ;;  %v42_v16 = vld [vmem:[%s860_s0 + $0xd8] sm:$0xff] }
   0x4   :  { %v29_v12 = vld [vmem:[%s860_s0 + $0x70] sm:$0xff]  ;;  %v52_v15 = vld [vmem:[%s860_s0 + $0x128] sm:$0xff]  ;;  %v54_v17 = vld [vmem:[%s860_s0 + $0x138] sm:$0xff] }
   0x5   :  { %546 = vmatprep.subr.bf16.mxu0 %v545_v4  ;;  %v555_v14 = vpack.c.bf16 %v29_v12, %v17_v11  ;;  %554 = vmatprep.subr.bf16.mxu1 %v553_v9  ;;  %v549_v18 = vpack.c.bf16 %v52_v15, %v40_v13  ;;  %v557_v19 = vpack.c.bf16 %v54_v17, %v42_v16  ;;  %v39_v20 = vld [vmem:[%s860_s0 + $0xc0] sm:$0xff]  ;;  %v41_v22 = vld [vmem:[%s860_s0 + $0xd0] sm:$0xff]  ;;  %v64_v26 = vld [vmem:[%s860_s0 + $0x188] sm:$0xff] }
   0x6   :  { %548 = vmatpush1.bf16.msra.mxu0 %v547_v10  ;;  %v51_v21 = vld [vmem:[%s860_s0 + $0x120] sm:$0xff]  ;;  %v53_v24 = vld [vmem:[%s860_s0 + $0x130] sm:$0xff]  ;;  %v66_v27 = vld [vmem:[%s860_s0 + $0x198] sm:$0xff] }
   0x7   :  { %556 = vmatpush1.bf16.msra.mxu1 %v555_v14  ;;  %v551_v23 = vpack.c.bf16 %v51_v21, %v39_v20  ;;  %550 = vmatprep.subr.bf16.mxu0 %v549_v18  ;;  %v559_v25 = vpack.c.bf16 %v53_v24, %v41_v22  ;;  %v63_v28 = vld [vmem:[%s860_s0 + $0x180] sm:$0xff]  ;;  %v20_v29 = vld [vmem:[%s860_s0 + $0x28] sm:$0xff]  ;;  %v22_v31 = vld [vmem:[%s860_s0 + $0x38] sm:$0xff] }
   0x8   :  { %558 = vmatprep.subr.bf16.mxu1 %v557_v19  ;;  %v32_v30 = vld [vmem:[%s860_s0 + $0x88] sm:$0xff]  ;;  %v65_v32 = vld [vmem:[%s860_s0 + $0x190] sm:$0xff]  ;;  %v692_v33 = vld [vmem:[%s861_s1] sm:$0xff] }
   0x9   :  { %v34_v34 = vld [vmem:[%s860_s0 + $0x98] sm:$0xff]  ;;  %v19_v35 = vld [vmem:[%s860_s0 + $0x20] sm:$0xff]  ;;  %v21_v37 = vld [vmem:[%s860_s0 + $0x30] sm:$0xff]  ;;  %v561_v40 = vpack.c.bf16 %v32_v30, %v20_v29 }
   0xa   :  { %552 = vmatpush1.bf16.msra.mxu0 %v551_v23  ;;  %v31_v36 = vld [vmem:[%s860_s0 + $0x80] sm:$0xff]  ;;  %v33_v38 = vld [vmem:[%s860_s0 + $0x90] sm:$0xff]  ;;  %v44_v39 = vld [vmem:[%s860_s0 + $0xe8] sm:$0xff]  ;;  %v569_v44 = vpack.c.bf16 %v34_v34, %v22_v31 }
   0xb   :  { %560 = vmatpush1.bf16.msra.mxu1 %v559_v25  ;;  %93 = vmatprep.subr.mxu0 %v64_v26  ;;  %v56_v41 = vld [vmem:[%s860_s0 + $0x148] sm:$0xff]  ;;  %v46_v42 = vld [vmem:[%s860_s0 + $0xf8] sm:$0xff]  ;;  %v563_v45 = vpack.c.bf16 %v31_v36, %v19_v35  ;;  %v571_v46 = vpack.c.bf16 %v33_v38, %v21_v37  ;;  %v43_v48 = vld [vmem:[%s860_s0 + $0xe0] sm:$0xff] }
   0xc   :  { %164 = vmatprep.subr.mxu1 %v66_v27  ;;  %v58_v43 = vld [vmem:[%s860_s0 + $0x158] sm:$0xff]  ;;  %v565_v47 = vpack.c.bf16 %v56_v41, %v44_v39  ;;  %v55_v49 = vld [vmem:[%s860_s0 + $0x140] sm:$0xff]  ;;  %v45_v51 = vld [vmem:[%s860_s0 + $0xf0] sm:$0xff] }
   0xd   :  { %v573_v50 = vpack.c.bf16 %v58_v43, %v46_v42  ;;  %v57_v52 = vld [vmem:[%s860_s0 + $0x150] sm:$0xff]  ;;  %v567_v53 = vpack.c.bf16 %v55_v49, %v43_v48  ;;  %v68_v55 = vld [vmem:[%s860_s0 + $0x1a8] sm:$0xff]  ;;  %v70_v56 = vld [vmem:[%s860_s0 + $0x1b8] sm:$0xff] }
   0xe   :  { %94 = vmatpush1.msra.mxu0 %v63_v28  ;;  %v575_v54 = vpack.c.bf16 %v57_v52, %v45_v51  ;;  %v24_v57 = vld [vmem:[%s860_s0 + $0x48] sm:$0xff]  ;;  %v67_v59 = vld [vmem:[%s860_s0 + $0x1a0] sm:$0xff]  ;;  %v26_v60 = vld [vmem:[%s860_s0 + $0x58] sm:$0xff] }
   0xf   :  { %165 = vmatpush1.msra.mxu1 %v65_v32  ;;  %539 = vmatmul.mubr.msk.f32.vlgmr.msra.gmra.mrb[0].mxu0 %vm81_vm0, %v692_v33  ;;  %v36_v58 = vld [vmem:[%s860_s0 + $0xa8] sm:$0xff]  ;;  %v38_v61 = vld [vmem:[%s860_s0 + $0xb8] sm:$0xff]  ;;  %v23_v62 = vld [vmem:[%s860_s0 + $0x40] sm:$0xff] }
  0x10   :  { %540 = vmatmul.mubr.msk.f32.vlgmr.msra.gmra.mrb[0].mxu1 %vm81_vm0, %v692_v33  ;;  %562 = vmatprep.subr.bf16.mxu0 %v561_v40  ;;  %v35_v63 = vld [vmem:[%s860_s0 + $0xa0] sm:$0xff]  ;;  %v25_v0 = vld [vmem:[%s860_s0 + $0x50] sm:$0xff]  ;;  %v48_v2 = vld [vmem:[%s860_s0 + $0x108] sm:$0xff]  ;;  %v577_v7 = vpack.c.bf16 %v36_v58, %v24_v57  ;;  %v585_v10 = vpack.c.bf16 %v38_v61, %v26_v60 }
  0x11   :  { %570 = vmatprep.subr.bf16.mxu1 %v569_v44  ;;  %564 = vmatpush1.bf16.msra.mxu0 %v563_v45  ;;  %v37_v1 = vld [vmem:[%s860_s0 + $0xb0] sm:$0xff]  ;;  %v60_v4 = vld [vmem:[%s860_s0 + $0x168] sm:$0xff]  ;;  %v75_v5 = vld [vmem:[%s862_s2] sm:$0xff]  ;;  %v579_v11 = vpack.c.bf16 %v35_v63, %v23_v62 }
  0x12   :  { %572 = vmatpush1.bf16.msra.mxu1 %v571_v46  ;;  %566 = vmatprep.subr.bf16.mxu0 %v565_v47  ;;  %v69_v6 = vld [vmem:[%s860_s0 + $0x1b0] sm:$0xff]  ;;  %v50_v8 = vld [vmem:[%s860_s0 + $0x118] sm:$0xff]  ;;  %v587_v12 = vpack.c.bf16 %v37_v1, %v25_v0  ;;  %v581_v13 = vpack.c.bf16 %v60_v4, %v48_v2  ;;  %v47_v14 = vld [vmem:[%s860_s0 + $0x100] sm:$0xff] }
  0x13   :  { %574 = vmatprep.subr.bf16.mxu1 %v573_v50  ;;  %291 = vmatprep.mubr.f32.mxu0 %v596_v3  ;;  %v62_v9 = vld [vmem:[%s860_s0 + $0x178] sm:$0xff]  ;;  %v59_v15 = vld [vmem:[%s860_s0 + $0x160] sm:$0xff]  ;;  %v49_v17 = vld [vmem:[%s860_s0 + $0x110] sm:$0xff] }
  0x14   :  { %362 = vmatprep.mubr.f32.mxu1 %v596_v3  ;;  %78 = vperm.xlu0 %595, %v75_v5   ;;  %v589_v16 = vpack.c.bf16 %v62_v9, %v50_v8  ;;  %v61_v18 = vld [vmem:[%s860_s0 + $0x170] sm:$0xff]  ;;  %v583_v19 = vpack.c.bf16 %v59_v15, %v47_v14  ;;  %v72_v21 = vld [vmem:[%s860_s0 + $0x1c8] sm:$0xff]  ;;  %v74_v22 = vld [vmem:[%s860_s0 + $0x1d8] sm:$0xff] }
  0x15   :  { %568 = vmatpush1.bf16.msra.mxu0 %v567_v53  ;;  %v591_v20 = vpack.c.bf16 %v61_v18, %v49_v17  ;;  %v71_v23 = vld [vmem:[%s860_s0 + $0x1c0] sm:$0xff]  ;;  %v73_v24 = vld [vmem:[%s860_s0 + $0x1d0] sm:$0xff] }
  0x16   :  { %576 = vmatpush1.bf16.msra.mxu1 %v575_v54  ;;  %235 = vmatprep.subr.mxu0 %v68_v55 }
  0x17   :  { %306 = vmatprep.subr.mxu1 %v70_v56 }
  0x19   :  { %236 = vmatpush1.msra.mxu0 %v67_v59 }
  0x1a   :  { %307 = vmatpush1.msra.mxu1 %v69_v6  ;;  %541 = vmatmul.mubr.msk.f32.vlgmr.msra.gmra.mrb[2].mxu0 %vm81_vm0, %v692_v33 }
  0x1b   :  { %542 = vmatmul.mubr.msk.f32.vlgmr.msra.gmra.mrb[2].mxu1 %vm81_vm0, %v692_v33  ;;  %578 = vmatprep.subr.bf16.mxu0 %v577_v7 }
  0x1c   :  { %586 = vmatprep.subr.bf16.mxu1 %v585_v10  ;;  %580 = vmatpush1.bf16.msra.mxu0 %v579_v11 }
  0x1d   :  { %588 = vmatpush1.bf16.msra.mxu1 %v587_v12  ;;  %582 = vmatprep.subr.bf16.mxu0 %v581_v13 }
  0x1e   :  { %590 = vmatprep.subr.bf16.mxu1 %v589_v16  ;;  %433 = vmatprep.mubr.f32.mxu0 %v596_v3 }
  0x1f   :  { %504 = vmatprep.mubr.f32.mxu1 %v596_v3 }
  0x20   :  { %584 = vmatpush1.bf16.msra.mxu0 %v583_v19 }
  0x21   :  { %592 = vmatpush1.bf16.msra.mxu1 %v591_v20  ;;  %377 = vmatprep.subr.mxu0 %v72_v21 }
  0x22   :  { %448 = vmatprep.subr.mxu1 %v74_v22 }
  0x24   :  { %378 = vmatpush1.msra.mxu0 %v71_v23 }
  0x25   :  { %449 = vmatpush1.msra.mxu1 %v73_v24  ;;  %543 = vmatmul.mubr.msk.f32.vlgmr.msra.gmra.mrb[4].mxu0 %vm81_vm0, %v692_v33 }
  0x26   :  { %544 = vmatmul.mubr.msk.f32.vlgmr.msra.gmra.mrb[4].mxu1 %vm81_vm0, %v692_v33 }
  0x93   :  { %v79_v3 = vpop.permute.xlu0 %78 }
  0xe2   :  { %v151_v25 = vpop.f32.mrb[0].mxu0 }
  0xe3   :  { %v222_v26 = vpop.f32.mrb[0].mxu1  ;;  %v152_v27 = vadd.f32 %v151_v25, %v79_v3  ;;  %v153_v28 = vpop.f32.mrb[1].mxu0 }
  0xe4   :  { %v223_v29 = vadd.f32 %v222_v26, %v79_v3  ;;  %v154_v30 = vadd.f32 %v153_v28, %v79_v3  ;;  %v224_v31 = vpop.f32.mrb[1].mxu1 }
  0xe5   :  { %v511_v32 = vmax.f32 %v152_v27, 0.0  ;;  %v225_v34 = vadd.f32 %v224_v31, %v79_v3 }
  0xe6   :  { %v513_v35 = vmax.f32 %v223_v29, 0.0  ;;  %v512_v36 = vmax.f32 %v154_v30, 0.0 }
  0xe7   :  { %523 = vst [vmem:[%s863_s3] sm:$0xff] %v511_v32  ;;  %v514_v37 = vmax.f32 %v225_v34, 0.0 }
  0xe8   :  { %525 = vst [vmem:[%s863_s3 + $0x10] sm:$0xff] %v513_v35  ;;  %524 = vst [vmem:[%s863_s3 + $0x8] sm:$0xff] %v512_v36 }
  0xe9   :  { %526 = vst [vmem:[%s863_s3 + $0x18] sm:$0xff] %v514_v37 }
  0xed   :  { %v293_v33 = vpop.f32.mrb[2].mxu0 }
  0xee   :  { %v294_v38 = vadd.f32 %v293_v33, %v79_v3  ;;  %v364_v39 = vpop.f32.mrb[2].mxu1  ;;  %v295_v40 = vpop.f32.mrb[3].mxu0 }
  0xef   :  { %v365_v41 = vadd.f32 %v364_v39, %v79_v3  ;;  %v296_v42 = vadd.f32 %v295_v40, %v79_v3  ;;  %v366_v43 = vpop.f32.mrb[3].mxu1 }
  0xf0   :  { %v515_v44 = vmax.f32 %v294_v38, 0.0  ;;  %v367_v45 = vadd.f32 %v366_v43, %v79_v3 }
  0xf1   :  { %v517_v46 = vmax.f32 %v365_v41, 0.0  ;;  %v516_v47 = vmax.f32 %v296_v42, 0.0 }
  0xf2   :  { %527 = vst [vmem:[%s863_s3 + $0x20] sm:$0xff] %v515_v44  ;;  %v518_v48 = vmax.f32 %v367_v45, 0.0 }
  0xf3   :  { %529 = vst [vmem:[%s863_s3 + $0x30] sm:$0xff] %v517_v46  ;;  %528 = vst [vmem:[%s863_s3 + $0x28] sm:$0xff] %v516_v47 }
  0xf4   :  { %530 = vst [vmem:[%s863_s3 + $0x38] sm:$0xff] %v518_v48 }
  0xf8   :  { %v435_v49 = vpop.f32.mrb[4].mxu0 }
  0xf9   :  { %v436_v50 = vadd.f32 %v435_v49, %v79_v3  ;;  %v506_v51 = vpop.f32.mrb[4].mxu1  ;;  %v437_v52 = vpop.f32.mrb[5].mxu0 }
  0xfa   :  { %v507_v53 = vadd.f32 %v506_v51, %v79_v3  ;;  %v438_v54 = vadd.f32 %v437_v52, %v79_v3  ;;  %v508_v55 = vpop.f32.mrb[5].mxu1 }
  0xfb   :  { %v519_v56 = vmax.f32 %v436_v50, 0.0  ;;  %v509_v57 = vadd.f32 %v508_v55, %v79_v3 }
  0xfc   :  { %v521_v58 = vmax.f32 %v507_v53, 0.0  ;;  %v520_v59 = vmax.f32 %v438_v54, 0.0 }
  0xfd   :  { %531 = vst [vmem:[%s863_s3 + $0x40] sm:$0xff] %v519_v56  ;;  %v522_v60 = vmax.f32 %v509_v57, 0.0 }
  0xfe   :  { %533 = vst [vmem:[%s863_s3 + $0x50] sm:$0xff] %v521_v58  ;;  %532 = vst [vmem:[%s863_s3 + $0x48] sm:$0xff] %v520_v59 }
  0xff   :  { %534 = vst [vmem:[%s863_s3 + $0x58] sm:$0xff] %v522_v60 }

</bundles_post_ra>
